<compile_context>
chip_gen: v7x
topology: tpu7x:2x2x1
jax: 0.10.0
libtpu: 0.0.40
codegen_flags: <defaults>
</compile_context>

<pallas_src>
import math

import jax
import jax.numpy as jnp
from jax.experimental import pallas as pl
from jax.experimental.pallas import tpu as pltpu  # noqa: F401  (TPU backend assumed)


W_ROWS = 200  # fixed by the module: torch.Tensor(200, 1)


def attention_kernel(w_ref, e_ref, o_ref):
    """Whole forward pass in one kernel (tiny working set -> single VMEM block).

    w_ref: (1, W_ROWS) f32 — lane-dense view of the (200, 1) weight matrix.
    e_ref: (1, D)      f32 — the embedding row.
    o_ref: (1, D)      f32 — the graph-level representation.
    """
    w_row = w_ref[...]  # (1, 200) f32, lane-dense
    e = e_ref[...]      # (1, D)   f32

    # mean(W @ E, axis=0) == (sum(w) / 200) * e   (W is (200,1), E is (1,D))
    w_mean = jnp.sum(w_row) * jnp.float32(1.0 / W_ROWS)   # scalar, single lane reduce

    transformed_global = jnp.tanh(w_mean * e)              # (1, D), EUP tanh

    # sigmoid(E @ transformed_global^T) -> scalar
    score = jnp.sum(e * transformed_global)                 # scalar dot product
    sig = jax.nn.sigmoid(score)                              # EUP logistic

    # representation = sigmoid_scores @ embedding -> (1, D)
    o_ref[...] = (sig * e).astype(o_ref.dtype)


def attention_module(weight_matrix: jax.Array, embedding: jax.Array) -> jax.Array:
    """weight_matrix: (200, 1) f32, embedding: (1, D) f32 -> representation (1, D) f32."""
    n, d = embedding.shape
    assert n == 1, "torch.matmul((200,1), embedding) requires embedding.shape[0] == 1"
    assert weight_matrix.shape == (W_ROWS, 1)

    # Present the weight lane-dense: (200,1) -> (1,200). Pure layout plumbing in the
    # wrapper; avoids 25 padded (8,128) tiles and a cross-sublane reduce in-kernel.
    w_row = weight_matrix.reshape(1, W_ROWS)

    cost = pl.CostEstimate(
        flops=4 * d + W_ROWS,                      # elementwise muls/adds + lane reduce
        transcendentals=d + 1,                     # tanh over D lanes + one sigmoid
        bytes_accessed=4 * (W_ROWS + 3 * d),       # w row + e in + o out (+ e reread)
    )

    return pl.pallas_call(
        attention_kernel,
        out_shape=jax.ShapeDtypeStruct((n, d), embedding.dtype),
        # Single grid point; every operand is one full VMEM block.
        in_specs=[
            pl.BlockSpec((1, W_ROWS), lambda: (0, 0)),
            pl.BlockSpec((n, d), lambda: (0, 0)),
        ],
        out_specs=pl.BlockSpec((n, d), lambda: (0, 0)),
        cost_estimate=cost,
    )(w_row, embedding)


def reference(weight_matrix: jax.Array, embedding: jax.Array) -> jax.Array:
    """Pure-JAX mirror of the PyTorch forward, for correctness checking."""
    global_context = jnp.mean(weight_matrix @ embedding, axis=0)               # (D,)
    transformed_global = jnp.tanh(global_context)                              # (D,)
    sigmoid_scores = jax.nn.sigmoid(embedding @ transformed_global[:, None])   # (1,1)
    return sigmoid_scores @ embedding                                          # (1,D)


def xavier_uniform(key, shape, dtype=jnp.float32):
    """torch.nn.init.xavier_uniform_ for a 2-D tensor: fan_in=shape[1], fan_out=shape[0]."""
    fan_out, fan_in = shape
    bound = math.sqrt(6.0 / (fan_in + fan_out))
    return jax.random.uniform(key, shape, dtype=dtype, minval=-bound, maxval=bound)


if __name__ == "__main__":
    key = jax.random.PRNGKey(0)
    k_w, k_e = jax.random.split(key)

    D = 128  # embedding feature dim (lane-aligned); module works for any D

    weight_matrix = xavier_uniform(k_w, (W_ROWS, 1))          # (200, 1)
    embedding = jax.random.normal(k_e, (1, D), jnp.float32)   # (1, D)

    out = attention_module(weight_matrix, embedding)
    out = jax.block_until_ready(out)

    ref = reference(weight_matrix, embedding)
    assert out.shape == (1, D) and out.dtype == jnp.float32
    assert jnp.allclose(out, ref, atol=1e-5, rtol=1e-5), "Pallas kernel mismatch vs reference"

    print("KERNEL_OK")
</pallas_src>

<mosaic_0001>
module attributes {stable_mosaic.version = 11 : i64} {
  func.func @attention_kernel(%arg0: memref<1x200xf32, #tpu.memory_space<vmem>>, %arg1: memref<1x128xf32, #tpu.memory_space<vmem>>, %arg2: memref<1x128xf32, #tpu.memory_space<vmem>>) attributes {dimension_semantics = [], scalar_prefetch = 0 : i64, scratch_operands = 0 : i64, tpu.core_type = #tpu.core_type<tc>} {
    %c0 = arith.constant 0 : index
    %c0_0 = arith.constant 0 : index
    %0 = vector.load %arg0[%c0, %c0_0] : memref<1x200xf32, #tpu.memory_space<vmem>>, vector<1x200xf32>
    %c0_1 = arith.constant 0 : index
    %c0_2 = arith.constant 0 : index
    %1 = vector.load %arg1[%c0_1, %c0_2] : memref<1x128xf32, #tpu.memory_space<vmem>>, vector<1x128xf32>
    %2 = vector.shape_cast %0 : vector<1x200xf32> to vector<1x1x200xf32>
    %cst = arith.constant dense<0.000000e+00> : vector<1xf32>
    %3 = vector.multi_reduction <add>, %2, %cst [1, 2] : vector<1x1x200xf32> to vector<1xf32>
    %4 = vector.shape_cast %3 : vector<1xf32> to vector<1x1x1xf32>
    %5 = vector.extract %4[0, 0, 0] : f32 from vector<1x1x1xf32>
    %cst_3 = arith.constant 5.000000e-03 : f32
    %6 = arith.mulf %5, %cst_3 : f32
    %7 = vector.broadcast %6 : f32 to vector<1x128xf32>
    %8 = arith.mulf %7, %1 : vector<1x128xf32>
    %9 = math.tanh %8 : vector<1x128xf32>
    %10 = arith.mulf %1, %9 : vector<1x128xf32>
    %11 = vector.shape_cast %10 : vector<1x128xf32> to vector<1x1x128xf32>
    %cst_4 = arith.constant dense<0.000000e+00> : vector<1xf32>
    %12 = vector.multi_reduction <add>, %11, %cst_4 [1, 2] : vector<1x1x128xf32> to vector<1xf32>
    %13 = vector.shape_cast %12 : vector<1xf32> to vector<1x1x1xf32>
    %14 = vector.extract %13[0, 0, 0] : f32 from vector<1x1x1xf32>
    %15 = arith.negf %14 : f32
    %16 = math.exp %15 : f32
    %cst_5 = arith.constant 1.000000e+00 : f32
    %17 = arith.addf %cst_5, %16 : f32
    %18 = arith.divf %cst_5, %17 : f32
    %19 = vector.broadcast %18 : f32 to vector<1x128xf32>
    %20 = arith.mulf %19, %1 : vector<1x128xf32>
    %c0_6 = arith.constant 0 : index
    %c0_7 = arith.constant 0 : index
    %21 = vector.load %arg2[%c0_6, %c0_7] : memref<1x128xf32, #tpu.memory_space<vmem>>, vector<1x128xf32>
    tpu.vector_store %arg2[%c0_6, %c0_7], %20 {strides = array<i32>} : memref<1x128xf32, #tpu.memory_space<vmem>>, vector<1x128xf32>,
    return
  }
}

</mosaic_0001>

<bundles_post_ra>
// kernel: tpu_custom_call.1
= control target key start
LH: loop header
LB: loop body
LE: loop exit
PB: predicated region body
PF: predicated region fallthrough
CT: control target
= control target key end

     0   :  { %7 = vsyncpa [#allocation3], 0  ;;  %s203_s0 = inlined_call_operand.hbm [shape: f32[1,200], index: 0, kind: input, shape index: {}]   ;;  %s204_s1 = inlined_call_operand.vmem [shape: f32[1,128], index: 1, kind: input, shape index: {}]   ;;  %s205_s2 = inlined_call_operand.hbm [shape: f32[1,128], index: 2, kind: output, shape index: {}]  }
   0x1   :  { %8 = vsyncpa [#allocation4], 0  ;;  %s157_s9 = smov [#allocation2]   ;;  %s109_s13 = scalar_lea.hbm %s203_s0, 32 }
   0x2   :  { %s15_s10 = sshll.u32 %s157_s9, 4  ;;  %p110_p0 = scmp.ne.s32.totalorder %s203_s0, %s109_s13  ;;  %s16_s10 = int_to_ptr.vmem [resolvable:$true] %s15_s10 }
   0x3   :  { %p113_p1 = scmp.lt.u32.totalorder %s109_s13, %s203_s0 }
   0x5   :  { %p115_p2 = pnand %p113_p1, %p110_p0 }
   0x7   :  { %118 = shalt.err (!%p115_p2)
}
   0x8   :  { %s119_s18 = scalar_lea.vmem %s16_s10, 32  ;;  %p124_p4 = scmp.lt.s32.totalorder %s16_s10, %s16_s10 }
   0x9   :  { %p120_p3 = scmp.ne.s32.totalorder %s16_s10, %s119_s18  ;;  %p125_p5 = scmp.lt.s32.totalorder %s119_s18, %s119_s18 }
   0xb   :  { %p126_p6 = por %p125_p5, %p124_p4 }
   0xd   :  { %p127_p7 = pnand %p126_p6, %p120_p3 }
   0xf   :  { %130 = shalt.err (!%p127_p7)
}
  0x10   :  { %18 = dma.hbm_to_vmem [thread:$0]  %s203_s0, 32, %s16_s10, [#allocation3]  }
  0x11   :  { %153 = dma.done.wait [#allocation3], 32  }
  0x12   :  { %154 = vsyncadd [#allocation3], 4294967264  ;;  %v27_v0 = vlaneseq  ;;  %v24_v4 = vld [vmem:[#allocation2] sm:$0x3]  ;;  %vm37_vm0 = vcmask 1040384   ;;  %vm39_vm1 = vcmask 581632  }
  0x13   :  { %v25_v17 = vld [vmem:[%s204_s1] sm:$0x1]  ;;  %s158_s27 = smov [#allocation5]  }
  0x14   :  { %v28_v1 = vshrl.u32 %v27_v0, 7  ;;  %s84_s28 = sshll.u32 %s158_s27, 4  ;;  %s85_s28 = int_to_ptr.vmem [resolvable:$true] %s84_s28 }
  0x15   :  { %s131_s30 = scalar_lea.vmem %s85_s28, 16  ;;  %s135_s3 = scalar_lea.vmem %s85_s28, 32 }
  0x16   :  { %v29_v2 = vsub.s32 0, %v28_v1  ;;  %v33_v3 = vsub.s32 1, %v28_v1  ;;  %p132_p8 = scmp.ne.s32.totalorder %s85_s28, %s131_s30  ;;  %p136_p9 = scmp.lt.s32.totalorder %s85_s28, %s85_s28 }
  0x17   :  { %p137_p10 = scmp.lt.s32.totalorder %s135_s3, %s131_s30 }
  0x18   :  { %v30_v5 = vrot.slane %v24_v4, %v29_v2  ;;  %v34_v6 = vrot.slane %v24_v4, %v33_v3 }
  0x19   :  { %p138_p11 = por %p137_p10, %p136_p9 }
  0x1a   :  { %v38_v7 = vsel %vm37_vm0, %v30_v5, 0.0  ;;  %v40_v8 = vsel %vm39_vm1, %v34_v6, 0.0 }
  0x1b   :  { %v41_v9 = vadd.f32 %v40_v8, %v38_v7  ;;  %p139_p12 = pnand %p138_p11, %p132_p8 }
  0x1d   :  { %42 = vadd.xlane.f32.xlu0 %v41_v9 }
  0xaa   :  { %v43_v10 = vpop.xlane.xlu0 %42 }
  0xab   :  { %v44_v11 = vrot.slane %v43_v10, 4 }
  0xad   :  { %v45_v12 = vadd.f32 %v44_v11, %v43_v10 }
  0xaf   :  { %v46_v13 = vrot.slane %v45_v12, 2 }
  0xb1   :  { %v47_v14 = vadd.f32 %v46_v13, %v45_v12 }
  0xb3   :  { %v48_v15 = vrot.slane %v47_v14, 1 }
  0xb5   :  { %v49_v16 = vadd.f32 %v48_v15, %v47_v14 }
  0xb7   :  { %93 = vpush %v49_v16 }
  0xe8   :  { %s94_s0 = spop %93 }
  0xe9   :  { %s51_s23 = smul.f32 0.005, %s94_s0 }
  0xeb   :  { %v52_v18 = vstv %s51_s23 }
  0xec   :  { %v53_v19 = vmul.f32 %v52_v18, %v25_v17 }
  0xee   :  { %103 = vtanh.f32 %v53_v19 }
  0xf8   :  { %v104_v20 = vpop.eup %103 }
  0xf9   :  { %v55_v21 = vmul.f32 %v104_v20, %v25_v17 }
  0xfb   :  { %v56_v22 = vsel %vm37_vm0, %v55_v21, 0.0 }
  0xfc   :  { %57 = vadd.xlane.f32.xlu0 %v56_v22 }
 0x189   :  { %v58_v23 = vpop.xlane.xlu0 %57 }
 0x18a   :  { %v59_v24 = vrot.slane %v58_v23, 4 }
 0x18c   :  { %v60_v25 = vadd.f32 %v59_v24, %v58_v23 }
 0x18e   :  { %v61_v26 = vrot.slane %v60_v25, 2 }
 0x190   :  { %v62_v27 = vadd.f32 %v61_v26, %v60_v25 }
 0x192   :  { %v63_v28 = vrot.slane %v62_v27, 1 }
 0x194   :  { %v64_v29 = vadd.f32 %v63_v28, %v62_v27 }
 0x196   :  { %95 = vpush %v64_v29 }
 0x1c7   :  { %s96_s24 = spop %95 }
 0x1c8   :  { %s66_s25 = sxor.u32 2147483648, %s96_s24 }
 0x1c9   :  { %v67_v30 = vstv %s66_s25 }
 0x1ca   :  { %v68_v31 = vmul.f32 1.442695, %v67_v30 }
 0x1cc   :  { %105 = vpow2.f32 %v68_v31 }
 0x1d6   :  { %v106_v32 = vpop.eup %105 }
 0x1d7   :  { %97 = vpush %v106_v32 }
 0x208   :  { %s98_s1 = spop %97 }
 0x209   :  { %s71_s26 = sadd.f32 1.0, %s98_s1 }
 0x20b   :  { %v72_v33 = vstv %s71_s26 }
 0x20c   :  { %107 = vrcp.f32 %v72_v33 }
 0x216   :  { %v108_v34 = vpop.eup %107 }
 0x217   :  { %99 = vpush %v108_v34 }
 0x248   :  { %s100_s29 = spop %99 }
 0x249   :  { %v75_v35 = vstv %s100_s29 }
 0x24a   :  { %v76_v36 = vmul.f32 %v75_v35, %v25_v17 }
 0x24c   :  { %77 = vst [vmem:[#allocation5] sm:$0x1] %v76_v36 }
 0x24d   :  { %142 = shalt.err (!%p139_p12)
}
 0x24e   :  { %s143_s6 = scalar_lea.hbm %s205_s2, 16 }
 0x24f   :  { %p144_p13 = scmp.ne.s32.totalorder %s205_s2, %s143_s6  ;;  %p147_p0 = scmp.lt.u32.totalorder %s143_s6, %s205_s2 }
 0x251   :  { %p149_p1 = pnand %p147_p0, %p144_p13 }
 0x253   :  { %152 = shalt.err (!%p149_p1)
}
 0x254   :  { %87 = dma.vmem_to_hbm [thread:$0]  %s85_s28, 16, %s205_s2, [#allocation4]  }
 0x255   :  { %155 = dma.done.wait [#allocation4], 16  }
 0x256   :  { %156 = vsyncadd [#allocation4], 4294967280 }
 0x257   :  { %91 = vsyncpa [#allocation3], 1 }
 0x258   :  { %92 = vsyncpa [#allocation4], 1 }

</bundles_post_ra>
